<compile_context>
chip_gen: v6e
topology: v6e:2x2x1
jax: 0.10.0
libtpu: 0.0.40
codegen_flags: <defaults>
</compile_context>

<pallas_src>
import jax
import jax.numpy as jnp
from jax.experimental import pallas as pl
from jax.experimental.pallas import tpu as pltpu

LATENT_DIMS = 2
N_CLASSES = 10
IMG_FLAT = 28 * 28  # 784
HIDDEN = 512


def _encoder_kernel(
    x_ref, y_ref, eps_ref,
    ew1x_ref, ew1y_ref, eb1_ref,
    ew23_ref, eb23_ref,
    z_ref, ms_ref,
):
    x = x_ref[...]        # (TB, 784) f32
    y = y_ref[...]        # (TB, 10)  f32 one-hot
    eps = eps_ref[...]    # (TB, L)   f32

    # ---- Linear1 over cat([x, y]): two MXU matmuls, bf16 operands, f32 acc ----
    hx = jnp.dot(
        x.astype(jnp.bfloat16), ew1x_ref[...],
        preferred_element_type=jnp.float32,
    )  # (TB, 512)
    hy = jnp.dot(
        y.astype(jnp.bfloat16), ew1y_ref[...],
        preferred_element_type=jnp.float32,
    )  # (TB, 512)  -- one-hot label contribution, tiny K, MXU has slack

    h = jnp.maximum(hx + hy + eb1_ref[...], 0.0)  # relu, f32 (TB, 512)

    # ---- Fused mu / log-sigma projection: one (512, 2L) matmul ----
    ms = jnp.dot(h, ew23_ref[...], preferred_element_type=jnp.float32) + eb23_ref[...]
    mu = ms[:, :LATENT_DIMS]          # (TB, L)
    log_sigma = ms[:, LATENT_DIMS:]   # (TB, L)  == pre-exp linear3 output
    sigma = jnp.exp(log_sigma)

    # Reparameterization: z = mu + sigma * eps  (eps ~ N(0,1) passed in).
    z_ref[...] = mu + sigma * eps
    # Emit the fused mu|log_sigma slab; KL is reduced (cheaply) in the wrapper.
    ms_ref[...] = ms


def _pick_batch_block(batch):
    """Batch-block: multiple of 8, <=1024, dividing `batch`, and giving >=2
    grid blocks when batch >= 16 so v7x's two TensorCores both get work."""
    if batch % 8 != 0 or batch < 16:
        return batch  # block dim == full array dim is always legal
    for cand in (1024, 512, 256, 128, 64, 32, 16, 8):
        if batch % cand == 0 and batch // cand >= 2:
            return cand
    return batch


def cond_vae_encoder_forward(x_nchw, y_onehot, eps, params):
    """x_nchw: (B, 1, 28, 28), y_onehot: (B, n_classes), eps: (B, latent)."""
    B = x_nchw.shape[0]
    x_flat = x_nchw.reshape(B, IMG_FLAT).astype(jnp.float32)
    y = y_onehot.astype(jnp.float32)
    eps = eps.astype(jnp.float32)

    ew1x, ew1y, eb1, ew23, eb23 = params

    tb = _pick_batch_block(B)
    num_blocks = B // tb

    def batch_spec(feat):
        return pl.BlockSpec((tb, feat), lambda i: (i, 0))

    def const_spec(shape):
        return pl.BlockSpec(shape, lambda i: (0, 0))  # weights stay VMEM-resident

    z, ms = pl.pallas_call(
        _encoder_kernel,
        out_shape=(
            jax.ShapeDtypeStruct((B, LATENT_DIMS), jnp.float32),
            jax.ShapeDtypeStruct((B, 2 * LATENT_DIMS), jnp.float32),
        ),
        grid=(num_blocks,),
        in_specs=[
            batch_spec(IMG_FLAT),                     # x
            batch_spec(N_CLASSES),                    # y (one-hot)
            batch_spec(LATENT_DIMS),                  # eps
            const_spec((IMG_FLAT, HIDDEN)),           # ew1x (bf16)
            const_spec((N_CLASSES, HIDDEN)),          # ew1y (bf16)
            const_spec((1, HIDDEN)),                  # eb1
            const_spec((HIDDEN, 2 * LATENT_DIMS)),    # ew23 (fused mu|logsig)
            const_spec((1, 2 * LATENT_DIMS)),         # eb23
        ],
        out_specs=(
            batch_spec(LATENT_DIMS),                  # z
            batch_spec(2 * LATENT_DIMS),              # ms = [mu | log_sigma]
        ),
        compiler_params=pltpu.CompilerParams(
            dimension_semantics=("parallel",),        # 2-TC sharding on v7x
            vmem_limit_bytes=32 * 1024 * 1024,
        ),
    )(x_flat, y, eps, ew1x, ew1y, eb1, ew23, eb23)

    # Tiny (B, 2L) reduction outside the kernel; log(sigma) taken pre-exp.
    mu = ms[:, :LATENT_DIMS]
    log_sigma = ms[:, LATENT_DIMS:]
    kl = jnp.sum(jnp.exp(2.0 * log_sigma) + mu * mu - log_sigma - 0.5)
    return z, kl


def init_params(key):
    """Deterministic parameter init; weights stored as (in, out)."""
    def linear(key, fan_in, fan_out):
        kw, kb = jax.random.split(key)
        bound = 1.0 / jnp.sqrt(fan_in)
        w = jax.random.uniform(kw, (fan_in, fan_out), jnp.float32, -bound, bound)
        b = jax.random.uniform(kb, (1, fan_out), jnp.float32, -bound, bound)
        return w, b

    keys = jax.random.split(key, 3)
    ew1, eb1 = linear(keys[0], IMG_FLAT + N_CLASSES, HIDDEN)
    ew2, eb2 = linear(keys[1], HIDDEN, LATENT_DIMS)
    ew3, eb3 = linear(keys[2], HIDDEN, LATENT_DIMS)

    # Pre-split the concatenated-input weight; both halves feed the MXU in bf16
    # (f32 accumulation). Documented quantization vs the f32 torch module.
    ew1x = ew1[:IMG_FLAT].astype(jnp.bfloat16)           # (784, 512) bf16
    ew1y = ew1[IMG_FLAT:].astype(jnp.bfloat16)            # (10, 512)  bf16
    # Fuse the mu / log-sigma projections into one matmul (kept f32 — tiny).
    ew23 = jnp.concatenate([ew2, ew3], axis=1)             # (512, 2*L) f32
    eb23 = jnp.concatenate([eb2, eb3], axis=1)             # (1, 2*L)   f32

    return ew1x, ew1y, eb1, ew23, eb23


if __name__ == "__main__":
    key = jax.random.PRNGKey(0)
    k_param, k_x, k_y, k_eps = jax.random.split(key, 4)

    B = 8
    params = init_params(k_param)

    x = jax.random.uniform(k_x, (B, 1, 28, 28), jnp.float32)        # NCHW images
    labels = jax.random.randint(k_y, (B,), 0, N_CLASSES)
    y = jax.nn.one_hot(labels, N_CLASSES, dtype=jnp.float32)        # (B, 10)
    # The torch module samples N(0,1) internally; we pass the sample explicitly.
    eps = jax.random.normal(k_eps, (B, LATENT_DIMS), jnp.float32)   # (B, L)

    z, kl = cond_vae_encoder_forward(x, y, eps, params)
    z = jax.block_until_ready(z)
    kl = jax.block_until_ready(kl)

    # Pure-JAX f32 reference. It uses the SAME bf16-quantized linear1 weights
    # (cast back to f32) and the concatenated [x, y] input, so the only
    # remaining difference vs the kernel is in-kernel bf16 activation rounding
    # and MXU accumulation order -> documented loose tolerance below.
    ew1x, ew1y, eb1, ew23, eb23 = params
    w1 = jnp.concatenate(
        [ew1x.astype(jnp.float32), ew1y.astype(jnp.float32)], axis=0)   # (794, 512)
    xy = jnp.concatenate([x.reshape(B, IMG_FLAT), y], axis=1)           # (B, 794)
    h_ref = jnp.maximum(xy @ w1 + eb1, 0.0)
    ms_ref = h_ref @ ew23 + eb23
    mu_r, ls_r = ms_ref[:, :LATENT_DIMS], ms_ref[:, LATENT_DIMS:]
    sig_r = jnp.exp(ls_r)
    z_ref = mu_r + sig_r * eps
    kl_ref = jnp.sum(sig_r * sig_r + mu_r * mu_r - ls_r - 0.5)

    assert z.shape == (B, LATENT_DIMS)
    assert jnp.isfinite(z).all() and jnp.isfinite(kl)
    # Tolerance covers bf16 activation rounding only (weights match the ref).
    assert jnp.allclose(z, z_ref, rtol=1e-1, atol=1e-1)
    assert jnp.allclose(kl, kl_ref, rtol=1e-1, atol=1e-1)
    print("KERNEL_OK")
</pallas_src>

<mosaic_0001>
module attributes {stable_mosaic.version = 11 : i64} {
  func.func @_encoder_kernel(%arg0: i32, %arg1: memref<8x784xf32, #tpu.memory_space<vmem>>, %arg2: memref<8x10xf32, #tpu.memory_space<vmem>>, %arg3: memref<8x2xf32, #tpu.memory_space<vmem>>, %arg4: memref<784x512xbf16, #tpu.memory_space<vmem>>, %arg5: memref<10x512xbf16, #tpu.memory_space<vmem>>, %arg6: memref<1x512xf32, #tpu.memory_space<vmem>>, %arg7: memref<512x4xf32, #tpu.memory_space<vmem>>, %arg8: memref<1x4xf32, #tpu.memory_space<vmem>>, %arg9: memref<8x2xf32, #tpu.memory_space<vmem>>, %arg10: memref<8x4xf32, #tpu.memory_space<vmem>>) attributes {dimension_semantics = [#tpu.dimension_semantics<parallel>], iteration_bounds = array<i64: 1>, scalar_prefetch = 0 : i64, scratch_operands = 0 : i64, tpu.core_type = #tpu.core_type<tc>, window_params = [{transform_indices = @transform_0, window_bounds = array<i64: 8, 784>}, {transform_indices = @transform_1, window_bounds = array<i64: 8, 10>}, {transform_indices = @transform_2, window_bounds = array<i64: 8, 2>}, {pipeline_mode = #tpu.pipeline_mode<synchronous>, transform_indices = @transform_3, window_bounds = array<i64: 784, 512>}, {pipeline_mode = #tpu.pipeline_mode<synchronous>, transform_indices = @transform_4, window_bounds = array<i64: 10, 512>}, {pipeline_mode = #tpu.pipeline_mode<synchronous>, transform_indices = @transform_5, window_bounds = array<i64: 1, 512>}, {pipeline_mode = #tpu.pipeline_mode<synchronous>, transform_indices = @transform_6, window_bounds = array<i64: 512, 4>}, {pipeline_mode = #tpu.pipeline_mode<synchronous>, transform_indices = @transform_7, window_bounds = array<i64: 1, 4>}, {transform_indices = @transform_8, window_bounds = array<i64: 8, 2>}, {transform_indices = @transform_9, window_bounds = array<i64: 8, 4>}]} {
    %c0 = arith.constant 0 : index
    %c0_0 = arith.constant 0 : index
    %0 = vector.load %arg1[%c0, %c0_0] : memref<8x784xf32, #tpu.memory_space<vmem>>, vector<8x784xf32>
    %c0_1 = arith.constant 0 : index
    %c0_2 = arith.constant 0 : index
    %1 = vector.load %arg2[%c0_1, %c0_2] : memref<8x10xf32, #tpu.memory_space<vmem>>, vector<8x10xf32>
    %c0_3 = arith.constant 0 : index
    %c0_4 = arith.constant 0 : index
    %2 = vector.load %arg3[%c0_3, %c0_4] : memref<8x2xf32, #tpu.memory_space<vmem>>, vector<8x2xf32>
    %3 = arith.truncf %0 : vector<8x784xf32> to vector<8x784xbf16>
    %c0_5 = arith.constant 0 : index
    %c0_6 = arith.constant 0 : index
    %4 = vector.load %arg4[%c0_5, %c0_6] : memref<784x512xbf16, #tpu.memory_space<vmem>>, vector<784x512xbf16>
    %cst = arith.constant dense<0.000000e+00> : vector<8x512xf32>
    %5 = tpu.matmul %3, %4, %cst {dimension_numbers = #tpu.dot_dimension_numbers<[1], [0], [0], [1], [0, 0, 1, 1], [], []>} : vector<8x784xbf16>, vector<784x512xbf16>, vector<8x512xf32> -> vector<8x512xf32>
    %6 = arith.truncf %1 : vector<8x10xf32> to vector<8x10xbf16>
    %c0_7 = arith.constant 0 : index
    %c0_8 = arith.constant 0 : index
    %7 = vector.load %arg5[%c0_7, %c0_8] : memref<10x512xbf16, #tpu.memory_space<vmem>>, vector<10x512xbf16>
    %cst_9 = arith.constant dense<0.000000e+00> : vector<8x512xf32>
    %8 = tpu.matmul %6, %7, %cst_9 {dimension_numbers = #tpu.dot_dimension_numbers<[1], [0], [0], [1], [0, 0, 1, 1], [], []>} : vector<8x10xbf16>, vector<10x512xbf16>, vector<8x512xf32> -> vector<8x512xf32>
    %9 = arith.addf %5, %8 : vector<8x512xf32>
    %c0_10 = arith.constant 0 : index
    %c0_11 = arith.constant 0 : index
    %10 = vector.load %arg6[%c0_10, %c0_11] : memref<1x512xf32, #tpu.memory_space<vmem>>, vector<1x512xf32>
    %11 = vector.broadcast %10 : vector<1x512xf32> to vector<8x512xf32>
    %12 = arith.addf %9, %11 : vector<8x512xf32>
    %cst_12 = arith.constant 0.000000e+00 : f32
    %13 = vector.broadcast %cst_12 : f32 to vector<8x512xf32>
    %14 = arith.maximumf %12, %13 : vector<8x512xf32>
    %c0_13 = arith.constant 0 : index
    %c0_14 = arith.constant 0 : index
    %15 = vector.load %arg7[%c0_13, %c0_14] : memref<512x4xf32, #tpu.memory_space<vmem>>, vector<512x4xf32>
    %cst_15 = arith.constant dense<0.000000e+00> : vector<8x4xf32>
    %16 = tpu.matmul %14, %15, %cst_15 {dimension_numbers = #tpu.dot_dimension_numbers<[1], [0], [0], [1], [0, 0, 1, 1], [], []>} : vector<8x512xf32>, vector<512x4xf32>, vector<8x4xf32> -> vector<8x4xf32>
    %c0_16 = arith.constant 0 : index
    %c0_17 = arith.constant 0 : index
    %17 = vector.load %arg8[%c0_16, %c0_17] : memref<1x4xf32, #tpu.memory_space<vmem>>, vector<1x4xf32>
    %18 = vector.broadcast %17 : vector<1x4xf32> to vector<8x4xf32>
    %19 = arith.addf %16, %18 : vector<8x4xf32>
    %20 = vector.extract_strided_slice %19 {offsets = [0, 0], sizes = [8, 2], strides = [1, 1]} : vector<8x4xf32> to vector<8x2xf32>
    %21 = vector.extract_strided_slice %19 {offsets = [0, 2], sizes = [8, 2], strides = [1, 1]} : vector<8x4xf32> to vector<8x2xf32>
    %22 = math.exp %21 : vector<8x2xf32>
    %23 = arith.mulf %22, %2 : vector<8x2xf32>
    %24 = arith.addf %20, %23 : vector<8x2xf32>
    %c0_18 = arith.constant 0 : index
    %c0_19 = arith.constant 0 : index
    %25 = vector.load %arg9[%c0_18, %c0_19] : memref<8x2xf32, #tpu.memory_space<vmem>>, vector<8x2xf32>
    tpu.vector_store %arg9[%c0_18, %c0_19], %24 {strides = array<i32>} : memref<8x2xf32, #tpu.memory_space<vmem>>, vector<8x2xf32>,
    %c0_20 = arith.constant 0 : index
    %c0_21 = arith.constant 0 : index
    %26 = vector.load %arg10[%c0_20, %c0_21] : memref<8x4xf32, #tpu.memory_space<vmem>>, vector<8x4xf32>
    tpu.vector_store %arg10[%c0_20, %c0_21], %19 {strides = array<i32>} : memref<8x4xf32, #tpu.memory_space<vmem>>, vector<8x4xf32>,
    return
  }
  func.func @transform_0(%arg0: i32) -> (i32, i32) {
    %c0_i32 = arith.constant 0 : i32
    %c0_i32_0 = arith.constant 0 : i32
    return %arg0, %c0_i32 : i32, i32
  }
  func.func @transform_1(%arg0: i32) -> (i32, i32) {
    %c0_i32 = arith.constant 0 : i32
    %c0_i32_0 = arith.constant 0 : i32
    return %arg0, %c0_i32 : i32, i32
  }
  func.func @transform_2(%arg0: i32) -> (i32, i32) {
    %c0_i32 = arith.constant 0 : i32
    %c0_i32_0 = arith.constant 0 : i32
    return %arg0, %c0_i32 : i32, i32
  }
  func.func @transform_3(%arg0: i32) -> (i32, i32) {
    %c0_i32 = arith.constant 0 : i32
    %c0_i32_0 = arith.constant 0 : i32
    %c0_i32_1 = arith.constant 0 : i32
    return %c0_i32, %c0_i32_0 : i32, i32
  }
  func.func @transform_4(%arg0: i32) -> (i32, i32) {
    %c0_i32 = arith.constant 0 : i32
    %c0_i32_0 = arith.constant 0 : i32
    %c0_i32_1 = arith.constant 0 : i32
    return %c0_i32, %c0_i32_0 : i32, i32
  }
  func.func @transform_5(%arg0: i32) -> (i32, i32) {
    %c0_i32 = arith.constant 0 : i32
    %c0_i32_0 = arith.constant 0 : i32
    %c0_i32_1 = arith.constant 0 : i32
    return %c0_i32, %c0_i32_0 : i32, i32
  }
  func.func @transform_6(%arg0: i32) -> (i32, i32) {
    %c0_i32 = arith.constant 0 : i32
    %c0_i32_0 = arith.constant 0 : i32
    %c0_i32_1 = arith.constant 0 : i32
    return %c0_i32, %c0_i32_0 : i32, i32
  }
  func.func @transform_7(%arg0: i32) -> (i32, i32) {
    %c0_i32 = arith.constant 0 : i32
    %c0_i32_0 = arith.constant 0 : i32
    %c0_i32_1 = arith.constant 0 : i32
    return %c0_i32, %c0_i32_0 : i32, i32
  }
  func.func @transform_8(%arg0: i32) -> (i32, i32) {
    %c0_i32 = arith.constant 0 : i32
    %c0_i32_0 = arith.constant 0 : i32
    return %arg0, %c0_i32 : i32, i32
  }
  func.func @transform_9(%arg0: i32) -> (i32, i32) {
    %c0_i32 = arith.constant 0 : i32
    %c0_i32_0 = arith.constant 0 : i32
    return %arg0, %c0_i32 : i32, i32
  }
}

</mosaic_0001>

<bundles_post_ra>
// kernel: tpu_custom_call.1
= control target key start
LH: loop header
LB: loop body
LE: loop exit
PB: predicated region body
PF: predicated region fallthrough
CT: control target
= control target key end

     0   :  { %15 = vsyncpa [#allocation3], 0  ;;  %s2563_s30 = smov [#allocation2]   ;;  %s2911_s0 = inlined_call_operand.vmem [shape: f32[8,784], index: 0, kind: input, shape index: {}]   ;;  %s2912_s1 = inlined_call_operand.vmem [shape: f32[8,10], index: 1, kind: input, shape index: {}]   ;;  %s2913_s2 = inlined_call_operand.vmem [shape: f32[8,2], index: 2, kind: input, shape index: {}]   ;;  %s2914_s3 = inlined_call_operand.hbm [shape: bf16[784,512], index: 3, kind: input, shape index: {}]   ;;  %s2915_s4 = inlined_call_operand.vmem [shape: bf16[10,512], index: 4, kind: input, shape index: {}]   ;;  %s2916_s5 = inlined_call_operand.vmem [shape: f32[1,512], index: 5, kind: input, shape index: {}]   ;;  %s2917_s6 = inlined_call_operand.vmem [shape: f32[512,4], index: 6, kind: input, shape index: {}]   ;;  %s2918_s7 = inlined_call_operand.vmem [shape: f32[1,4], index: 7, kind: input, shape index: {}]   ;;  %s2919_s8 = inlined_call_operand.vmem [shape: f32[8,2], index: 8, kind: output, shape index: {0}]   ;;  %s2920_s9 = inlined_call_operand.vmem [shape: f32[8,4], index: 9, kind: output, shape index: {1}]  }
   0x1   :  { %s27_s10 = sshll.u32 %s2563_s30, 4  ;;  %s28_s10 = int_to_ptr.vmem [resolvable:$true] %s27_s10 }
   0x2   :  { %s2549_s11 = scalar_lea.vmem %s28_s10, 25088  ;;  %p2554_p1 = scmp.lt.s32.totalorder %s28_s10, %s28_s10 }
   0x3   :  { %p2550_p0 = scmp.ne.s32.totalorder %s28_s10, %s2549_s11  ;;  %p2555_p2 = scmp.lt.s32.totalorder %s2549_s11, %s2549_s11 }
   0x5   :  { %p2556_p3 = por %p2555_p2, %p2554_p1 }
   0x7   :  { %p2557_p4 = pnand %p2556_p3, %p2550_p0 }
   0x9   :  { %2560 = shalt.err (!%p2557_p4)
}
   0xa   :  { %s2564_s12 = smov 256   ;;  %s2565_s13 = smov 16  }
   0xb   :  { %33 = dma.hbm_to_vmem [thread:$0]  %s2914_s3, 25088, %s28_s10, [#allocation3], %s2564_s12, %s2564_s12, %s2565_s13  }
   0xc   :  { %2561 = dma.done.wait [#allocation3], 25088  }
   0xd   :  { %2562 = vsyncadd [#allocation3], 4294942208  ;;  %v2566_v0 = vmov 0   ;;  %vm283_vm0 = vcmask 1044480   ;;  %v53_v5 = vld [vmem:[%s2912_s1] sm:$0xff]  ;;  %vm279_vm1 = vcmask 80896  }
   0xe   :  { %328 = vmatprep.mubr.bf16.mxu0 %v2566_v0  ;;  %369 = vmatprep.mubr.bf16.mxu1 %v2566_v0  ;;  %v2239_v1 = vld [vmem:[%s2915_s4 + $0x4] ss:$16 sps:$4 sm:$0x1f]   ;;  %v2241_v2 = vld [vmem:[%s2915_s4 + $0xc] ss:$16 sps:$4 sm:$0x1f]   ;;  %v258_v8 = vpack.c.bf16 %v53_v5, %v53_v5 }
   0xf   :  { %1960 = vmatprep.subr.msk.bf16.mxu0 %vm283_vm0, %v2239_v1  ;;  %v2243_v3 = vld [vmem:[%s2915_s4] ss:$16 sps:$4 sm:$0x1f]   ;;  %v2244_v4 = vld [vmem:[%s2915_s4 + $0x8] ss:$16 sps:$4 sm:$0x1f]   ;;  %1962 = vmatprep.subr.msk.bf16.mxu1 %vm283_vm0, %v2241_v2 }
  0x10   :  { %v285_v6 = vsel %vm283_vm0, %v2243_v3, 0  ;;  %v291_v7 = vsel %vm283_vm0, %v2244_v4, 0  ;;  %v2245_v9 = vld [vmem:[#allocation2 + $0xe0] ss:$16 sps:$4 sm:$0xff]   ;;  %v2247_v10 = vld [vmem:[#allocation2 + $0xe4] ss:$16 sps:$4 sm:$0xff]  }
  0x11   :  { %311 = vmatpush1.bf16.msra.mxu0 %v285_v6  ;;  %352 = vmatpush1.bf16.msra.mxu1 %v291_v7  ;;  %v2248_v11 = vld [vmem:[#allocation2 + $0x2e0] ss:$16 sps:$4 sm:$0xff]   ;;  %v2250_v12 = vld [vmem:[#allocation2 + $0x2e4] ss:$16 sps:$4 sm:$0xff]   ;;  %v47_v54 = vld [vmem:[%s2911_s0 + $0x8] sm:$0xff]  ;;  %vm1358_vm2 = vcmask 130048  }
  0x12   :  { %1362 = vmatprep.subr.bf16.mxu0 %v2247_v10  ;;  %v2253_v13 = vld [vmem:[#allocation2 + $0xc4] ss:$16 sps:$4 sm:$0xff]   ;;  %v2251_v14 = vld [vmem:[#allocation2 + $0xc0] ss:$16 sps:$4 sm:$0xff]   ;;  %1403 = vmatprep.subr.bf16.mxu1 %v2250_v12  ;;  %v49_v55 = vld [vmem:[%s2911_s0 + $0x18] sm:$0xff]  ;;  %v2645_v57 = vpack.c.bf16 %v47_v54, %v47_v54  ;;  %s2567_s20 = smov 2  }
  0x13   :  { %v2256_v15 = vld [vmem:[#allocation2 + $0x2c4] ss:$16 sps:$4 sm:$0xff]   ;;  %v2254_v16 = vld [vmem:[#allocation2 + $0x2c0] ss:$16 sps:$4 sm:$0xff]   ;;  %v2647_v58 = vpack.c.bf16 %v49_v55, %v49_v55  ;;  %v2386_v54 = vld [vmem:[#allocation2 + $0x28] ss:$16 sps:$4 sm:$0xff]  }
  0x14   :  { %1961 = vmatmul.mubr.msk.bf16.vlgmr.msra.gmra.mxu0 %vm279_vm1, %v258_v8  ;;  %1963 = vmatmul.mubr.msk.bf16.vlgmr.msra.gmra.mxu1 %vm279_vm1, %v258_v8  ;;  %v2259_v17 = vld [vmem:[#allocation2 + $0xa4] ss:$16 sps:$4 sm:$0xff]   ;;  %v2257_v19 = vld [vmem:[#allocation2 + $0xa0] ss:$16 sps:$4 sm:$0xff]   ;;  %vm1945_vm3 = vcmask 31744   ;;  %s2568_s23 = smov 126  }
  0x15   :  { %1363 = vmatpush1.bf16.msra.mxu0 %v2245_v9  ;;  %1404 = vmatpush1.bf16.msra.mxu1 %v2248_v11  ;;  %v2262_v18 = vld [vmem:[#allocation2 + $0x2a4] ss:$16 sps:$4 sm:$0xff]   ;;  %v2260_v20 = vld [vmem:[#allocation2 + $0x2a0] ss:$16 sps:$4 sm:$0xff]   ;;  %vm1943_vm4 = vcmask 15360  }
  0x16   :  { %1364 = vmatprep.subr.bf16.mxu0 %v2253_v13  ;;  %1405 = vmatprep.subr.bf16.mxu1 %v2256_v15  ;;  %v2265_v21 = vld [vmem:[#allocation2 + $0x84] ss:$16 sps:$4 sm:$0xff]   ;;  %v2263_v23 = vld [vmem:[#allocation2 + $0x80] ss:$16 sps:$4 sm:$0xff]  }
  0x17   :  { %v2268_v22 = vld [vmem:[#allocation2 + $0x284] ss:$16 sps:$4 sm:$0xff]   ;;  %v2266_v24 = vld [vmem:[#allocation2 + $0x280] ss:$16 sps:$4 sm:$0xff]   ;;  %1394 = vmatprep.mubr.bf16.mxu0 %v2645_v57  ;;  %1435 = vmatprep.mubr.bf16.mxu1 %v2647_v58 }
  0x18   :  { %v2271_v25 = vld [vmem:[#allocation2 + $0x64] ss:$16 sps:$4 sm:$0xff]   ;;  %v2269_v27 = vld [vmem:[#allocation2 + $0x60] ss:$16 sps:$4 sm:$0xff]  }
  0x19   :  { %1365 = vmatpush1.bf16.msra.mxu0 %v2251_v14  ;;  %1406 = vmatpush1.bf16.msra.mxu1 %v2254_v16  ;;  %v2274_v26 = vld [vmem:[#allocation2 + $0x264] ss:$16 sps:$4 sm:$0xff]   ;;  %v2272_v28 = vld [vmem:[#allocation2 + $0x260] ss:$16 sps:$4 sm:$0xff]  }
  0x1a   :  { %1366 = vmatprep.subr.bf16.mxu0 %v2259_v17  ;;  %1407 = vmatprep.subr.bf16.mxu1 %v2262_v18  ;;  %v2277_v29 = vld [vmem:[#allocation2 + $0x44] ss:$16 sps:$4 sm:$0xff]   ;;  %v2275_v31 = vld [vmem:[#allocation2 + $0x40] ss:$16 sps:$4 sm:$0xff]  }
  0x1b   :  { %v2280_v30 = vld [vmem:[#allocation2 + $0x244] ss:$16 sps:$4 sm:$0xff]   ;;  %v2278_v32 = vld [vmem:[#allocation2 + $0x240] ss:$16 sps:$4 sm:$0xff]  }
  0x1c   :  { %v2283_v33 = vld [vmem:[#allocation2 + $0x24] ss:$16 sps:$4 sm:$0xff]   ;;  %v2281_v35 = vld [vmem:[#allocation2 + $0x20] ss:$16 sps:$4 sm:$0xff]  }
  0x1d   :  { %1367 = vmatpush1.bf16.msra.mxu0 %v2257_v19  ;;  %1408 = vmatpush1.bf16.msra.mxu1 %v2260_v20  ;;  %v2286_v34 = vld [vmem:[#allocation2 + $0x224] ss:$16 sps:$4 sm:$0xff]   ;;  %v2284_v36 = vld [vmem:[#allocation2 + $0x220] ss:$16 sps:$4 sm:$0xff]  }
  0x1e   :  { %1368 = vmatprep.subr.bf16.mxu0 %v2265_v21  ;;  %1409 = vmatprep.subr.bf16.mxu1 %v2268_v22  ;;  %v2289_v37 = vld [vmem:[#allocation2 + $0x4] ss:$16 sps:$4 sm:$0xff]   ;;  %v2287_v39 = vld [vmem:[#allocation2] ss:$16 sps:$4 sm:$0xff]  }
  0x1f   :  { %v2292_v38 = vld [vmem:[#allocation2 + $0x204] ss:$16 sps:$4 sm:$0xff]   ;;  %v2290_v40 = vld [vmem:[#allocation2 + $0x200] ss:$16 sps:$4 sm:$0xff]  }
  0x20   :  { %v2295_v41 = vld [vmem:[#allocation2 + $0x1e4] ss:$16 sps:$4 sm:$0xff]   ;;  %v2293_v43 = vld [vmem:[#allocation2 + $0x1e0] ss:$16 sps:$4 sm:$0xff]  }
  0x21   :  { %1369 = vmatpush1.bf16.msra.mxu0 %v2263_v23  ;;  %1410 = vmatpush1.bf16.msra.mxu1 %v2266_v24  ;;  %v2298_v42 = vld [vmem:[#allocation2 + $0x3e4] ss:$16 sps:$4 sm:$0xff]   ;;  %v2296_v44 = vld [vmem:[#allocation2 + $0x3e0] ss:$16 sps:$4 sm:$0xff]   ;;  %v2352_v23 = vld [vmem:[#allocation2 + $0xec] ss:$16 sps:$4 sm:$0xff]  }
  0x22   :  { %1370 = vmatprep.subr.bf16.mxu0 %v2271_v25  ;;  %1411 = vmatprep.subr.bf16.mxu1 %v2274_v26  ;;  %v2301_v45 = vld [vmem:[#allocation2 + $0x1c4] ss:$16 sps:$4 sm:$0xff]   ;;  %v2299_v47 = vld [vmem:[#allocation2 + $0x1c0] ss:$16 sps:$4 sm:$0xff]  }
  0x23   :  { %v2304_v46 = vld [vmem:[#allocation2 + $0x3c4] ss:$16 sps:$4 sm:$0xff]   ;;  %v2302_v48 = vld [vmem:[#allocation2 + $0x3c0] ss:$16 sps:$4 sm:$0xff]  }
  0x24   :  { %v2307_v49 = vld [vmem:[#allocation2 + $0x1a4] ss:$16 sps:$4 sm:$0xff]   ;;  %v2305_v51 = vld [vmem:[#allocation2 + $0x1a0] ss:$16 sps:$4 sm:$0xff]  }
  0x25   :  { %1371 = vmatpush1.bf16.msra.mxu0 %v2269_v27  ;;  %1412 = vmatpush1.bf16.msra.mxu1 %v2272_v28  ;;  %v2310_v50 = vld [vmem:[#allocation2 + $0x3a4] ss:$16 sps:$4 sm:$0xff]   ;;  %v2308_v52 = vld [vmem:[#allocation2 + $0x3a0] ss:$16 sps:$4 sm:$0xff]  }
  0x26   :  { %1372 = vmatprep.subr.bf16.mxu0 %v2277_v29  ;;  %1413 = vmatprep.subr.bf16.mxu1 %v2280_v30  ;;  %v2313_v53 = vld [vmem:[#allocation2 + $0x184] ss:$16 sps:$4 sm:$0xff]   ;;  %v2311_v59 = vld [vmem:[#allocation2 + $0x180] ss:$16 sps:$4 sm:$0xff]   ;;  %v2350_v29 = vld [vmem:[#allocation2 + $0xe8] ss:$16 sps:$4 sm:$0xff]  }
  0x27   :  { %v2316_v56 = vld [vmem:[#allocation2 + $0x384] ss:$16 sps:$4 sm:$0xff]   ;;  %v2314_v60 = vld [vmem:[#allocation2 + $0x380] ss:$16 sps:$4 sm:$0xff]  }
  0x28   :  { %v2319_v61 = vld [vmem:[#allocation2 + $0x164] ss:$16 sps:$4 sm:$0xff]   ;;  %v2317_v63 = vld [vmem:[#allocation2 + $0x160] ss:$16 sps:$4 sm:$0xff]  }
  0x29   :  { %1373 = vmatpush1.bf16.msra.mxu0 %v2275_v31  ;;  %1414 = vmatpush1.bf16.msra.mxu1 %v2278_v32  ;;  %v2322_v62 = vld [vmem:[#allocation2 + $0x364] ss:$16 sps:$4 sm:$0xff]   ;;  %v2320_v1 = vld [vmem:[#allocation2 + $0x360] ss:$16 sps:$4 sm:$0xff]   ;;  %v2358_v31 = vld [vmem:[#allocation2 + $0xcc] ss:$16 sps:$4 sm:$0xff]  }
  0x2a   :  { %1374 = vmatprep.subr.bf16.mxu0 %v2283_v33  ;;  %1415 = vmatprep.subr.bf16.mxu1 %v2286_v34  ;;  %v2325_v2 = vld [vmem:[#allocation2 + $0x144] ss:$16 sps:$4 sm:$0xff]   ;;  %v2323_v4 = vld [vmem:[#allocation2 + $0x140] ss:$16 sps:$4 sm:$0xff]   ;;  %v2356_v33 = vld [vmem:[#allocation2 + $0xc8] ss:$16 sps:$4 sm:$0xff]  }
  0x2b   :  { %v2328_v3 = vld [vmem:[#allocation2 + $0x344] ss:$16 sps:$4 sm:$0xff]   ;;  %v2326_v5 = vld [vmem:[#allocation2 + $0x340] ss:$16 sps:$4 sm:$0xff]  }
  0x2c   :  { %v2331_v6 = vld [vmem:[#allocation2 + $0x124] ss:$16 sps:$4 sm:$0xff]   ;;  %v2329_v8 = vld [vmem:[#allocation2 + $0x120] ss:$16 sps:$4 sm:$0xff]  }
  0x2d   :  { %1375 = vmatpush1.bf16.msra.mxu0 %v2281_v35  ;;  %1416 = vmatpush1.bf16.msra.mxu1 %v2284_v36  ;;  %v2334_v7 = vld [vmem:[#allocation2 + $0x324] ss:$16 sps:$4 sm:$0xff]   ;;  %v2332_v9 = vld [vmem:[#allocation2 + $0x320] ss:$16 sps:$4 sm:$0xff]   ;;  %v2364_v35 = vld [vmem:[#allocation2 + $0xac] ss:$16 sps:$4 sm:$0xff]  }
  0x2e   :  { %1376 = vmatprep.subr.bf16.mxu0 %v2289_v37  ;;  %1417 = vmatprep.subr.bf16.mxu1 %v2292_v38  ;;  %v2337_v10 = vld [vmem:[#allocation2 + $0x104] ss:$16 sps:$4 sm:$0xff]   ;;  %v2335_v11 = vld [vmem:[#allocation2 + $0x100] ss:$16 sps:$4 sm:$0xff]   ;;  %v2362_v37 = vld [vmem:[#allocation2 + $0xa8] ss:$16 sps:$4 sm:$0xff]  }
  0x2f   :  { %v2340_v12 = vld [vmem:[#allocation2 + $0x304] ss:$16 sps:$4 sm:$0xff]   ;;  %v2338_v13 = vld [vmem:[#allocation2 + $0x300] ss:$16 sps:$4 sm:$0xff]  }
  0x30   :  { %v46_v14 = vld [vmem:[%s2911_s0] sm:$0xff]  ;;  %v48_v15 = vld [vmem:[%s2911_s0 + $0x10] sm:$0xff] }
  0x31   :  { %1377 = vmatpush1.bf16.msra.mxu0 %v2287_v39  ;;  %1418 = vmatpush1.bf16.msra.mxu1 %v2290_v40  ;;  %v2343_v16 = vld [vmem:[#allocation2 + $0x4e4] ss:$16 sps:$4 sm:$0xff]   ;;  %v2657_v18 = vpack.c.bf16 %v46_v14, %v46_v14  ;;  %v2659_v19 = vpack.c.bf16 %v48_v15, %v48_v15  ;;  %v2341_v20 = vld [vmem:[#allocation2 + $0x4e0] ss:$16 sps:$4 sm:$0xff]   ;;  %v2370_v39 = vld [vmem:[#allocation2 + $0x8c] ss:$16 sps:$4 sm:$0xff]  }
  0x32   :  { %1378 = vmatprep.subr.bf16.mxu0 %v2295_v41  ;;  %1419 = vmatprep.subr.bf16.mxu1 %v2298_v42  ;;  %v2346_v17 = vld [vmem:[#allocation2 + $0x604] ss:$16 sps:$4 sm:$0xff]   ;;  %v2344_v21 = vld [vmem:[#allocation2 + $0x600] ss:$16 sps:$4 sm:$0xff]   ;;  %v51_v41 = vld [vmem:[%s2911_s0 + $0x28] sm:$0xff] }
  0x33   :  { %v2349_v22 = vld [vmem:[#allocation2 + $0x4c4] ss:$16 sps:$4 sm:$0xff]   ;;  %v2347_v24 = vld [vmem:[#allocation2 + $0x4c0] ss:$16 sps:$4 sm:$0xff]   ;;  %v2368_v42 = vld [vmem:[#allocation2 + $0x88] ss:$16 sps:$4 sm:$0xff]  }
  0x34   :  { %v2355_v25 = vld [vmem:[#allocation2 + $0x4a4] ss:$16 sps:$4 sm:$0xff]   ;;  %v2353_v27 = vld [vmem:[#allocation2 + $0x4a0] ss:$16 sps:$4 sm:$0xff]   ;;  %v2424_v15 = vld [vmem:[#allocation2 + $0x16c] ss:$16 sps:$4 sm:$0xff]  }
  0x35   :  { %1379 = vmatpush2.bf16.msra.mxu0 %v2293_v43  ;;  %1420 = vmatpush2.bf16.msra.mxu1 %v2296_v44  ;;  %v52_v26 = vld [vmem:[%s2911_s0 + $0x30] sm:$0xff]  ;;  %v2675_v44 = vpack.c.bf16 %v51_v41, %v51_v41  ;;  %v2455_v41 = vld [vmem:[#allocation2 + $0x288] ss:$16 sps:$4 sm:$0xff]  }
  0x36   :  { %1380 = vmatprep.subr.bf16.mxu0 %v2301_v45  ;;  %1421 = vmatprep.subr.bf16.mxu1 %v2304_v46  ;;  %v2667_v28 = vpack.c.bf16 %v52_v26, %v52_v26  ;;  %v2361_v30 = vld [vmem:[#allocation2 + $0x484] ss:$16 sps:$4 sm:$0xff]   ;;  %v2359_v32 = vld [vmem:[#allocation2 + $0x480] ss:$16 sps:$4 sm:$0xff]   ;;  %v2376_v45 = vld [vmem:[#allocation2 + $0x6c] ss:$16 sps:$4 sm:$0xff]  }
  0x37   :  { %v2367_v34 = vld [vmem:[#allocation2 + $0x464] ss:$16 sps:$4 sm:$0xff]   ;;  %v2365_v36 = vld [vmem:[#allocation2 + $0x460] ss:$16 sps:$4 sm:$0xff]   ;;  %v2374_v46 = vld [vmem:[#allocation2 + $0x68] ss:$16 sps:$4 sm:$0xff]  }
  0x38   :  { %v2373_v38 = vld [vmem:[#allocation2 + $0x444] ss:$16 sps:$4 sm:$0xff]   ;;  %v2371_v40 = vld [vmem:[#allocation2 + $0x440] ss:$16 sps:$4 sm:$0xff]   ;;  %v2436_v26 = vld [vmem:[#allocation2 + $0x12c] ss:$16 sps:$4 sm:$0xff]  }
  0x39   :  { %1381 = vmatpush2.bf16.msra.mxu0 %v2299_v47  ;;  %1422 = vmatpush2.bf16.msra.mxu1 %v2302_v48  ;;  %v2379_v43 = vld [vmem:[#allocation2 + $0x424] ss:$16 sps:$4 sm:$0xff]   ;;  %v2377_v47 = vld [vmem:[#allocation2 + $0x420] ss:$16 sps:$4 sm:$0xff]  }
  0x3a   :  { %1382 = vmatprep.subr.bf16.mxu0 %v2307_v49  ;;  %1423 = vmatprep.subr.bf16.mxu1 %v2310_v50  ;;  %v2385_v48 = vld [vmem:[#allocation2 + $0x404] ss:$16 sps:$4 sm:$0xff]   ;;  %v2382_v49 = vld [vmem:[#allocation2 + $0x4c] ss:$16 sps:$4 sm:$0xff]   ;;  %v2380_v50 = vld [vmem:[#allocation2 + $0x48] ss:$16 sps:$4 sm:$0xff]  }
  0x3b   :  { %v2389_v55 = vld [vmem:[#allocation2 + $0x5e0] ss:$16 sps:$4 sm:$0xff]   ;;  %v2427_v14 = vld [vmem:[#allocation2 + $0x524] ss:$16 sps:$4 sm:$0xff]  }
  0x3d   :  { %1383 = vmatpush2.bf16.msra.mxu0 %v2305_v51  ;;  %1424 = vmatpush2.bf16.msra.mxu1 %v2308_v52  ;;  %v2383_v51 = vld [vmem:[#allocation2 + $0x400] ss:$16 sps:$4 sm:$0xff]   ;;  %v2391_v52 = vld [vmem:[#allocation2 + $0x5e4] ss:$16 sps:$4 sm:$0xff]  }
  0x3e   :  { %1384 = vmatprep.subr.bf16.mxu0 %v2313_v53  ;;  %1425 = vmatprep.subr.bf16.mxu1 %v2316_v56  ;;  %v2388_v53 = vld [vmem:[#allocation2 + $0x2c] ss:$16 sps:$4 sm:$0xff]   ;;  %v2397_v56 = vld [vmem:[#allocation2 + $0x5c4] ss:$16 sps:$4 sm:$0xff]  }
  0x41   :  { %1385 = vmatpush2.bf16.msra.mxu0 %v2311_v59  ;;  %1426 = vmatpush2.bf16.msra.mxu1 %v2314_v60  ;;  %v2392_v59 = vld [vmem:[#allocation2 + $0x8] ss:$16 sps:$4 sm:$0xff]   ;;  %v2395_v60 = vld [vmem:[#allocation2 + $0x5c0] ss:$16 sps:$4 sm:$0xff]  }
  0x42   :  { %1386 = vmatprep.subr.bf16.mxu0 %v2319_v61  ;;  %1427 = vmatprep.subr.bf16.mxu1 %v2322_v62  ;;  %v2403_v61 = vld [vmem:[#allocation2 + $0x5a4] ss:$16 sps:$4 sm:$0xff]   ;;  %v2400_v62 = vld [vmem:[#allocation2 + $0x1ec] ss:$16 sps:$4 sm:$0xff]  }
  0x45   :  { %1387 = vmatpush2.bf16.msra.mxu0 %v2317_v63  ;;  %1428 = vmatpush2.bf16.msra.mxu1 %v2320_v1  ;;  %v2398_v63 = vld [vmem:[#allocation2 + $0x1e8] ss:$16 sps:$4 sm:$0xff]   ;;  %v2401_v1 = vld [vmem:[#allocation2 + $0x5a0] ss:$16 sps:$4 sm:$0xff]  }
  0x46   :  { %1388 = vmatprep.subr.bf16.mxu0 %v2325_v2  ;;  %1429 = vmatprep.subr.bf16.mxu1 %v2328_v3  ;;  %v2409_v2 = vld [vmem:[#allocation2 + $0x584] ss:$16 sps:$4 sm:$0xff]   ;;  %v2406_v3 = vld [vmem:[#allocation2 + $0x1cc] ss:$16 sps:$4 sm:$0xff]  }
  0x49   :  { %1389 = vmatpush2.bf16.msra.mxu0 %v2323_v4  ;;  %1430 = vmatpush2.bf16.msra.mxu1 %v2326_v5  ;;  %v2404_v4 = vld [vmem:[#allocation2 + $0x1c8] ss:$16 sps:$4 sm:$0xff]   ;;  %v2407_v5 = vld [vmem:[#allocation2 + $0x580] ss:$16 sps:$4 sm:$0xff]  }
  0x4a   :  { %1390 = vmatprep.subr.bf16.mxu0 %v2331_v6  ;;  %1431 = vmatprep.subr.bf16.mxu1 %v2334_v7  ;;  %v2415_v6 = vld [vmem:[#allocation2 + $0x564] ss:$16 sps:$4 sm:$0xff]   ;;  %v2412_v7 = vld [vmem:[#allocation2 + $0x1ac] ss:$16 sps:$4 sm:$0xff]  }
  0x4d   :  { %1391 = vmatpush2.bf16.msra.mxu0 %v2329_v8  ;;  %1432 = vmatpush2.bf16.msra.mxu1 %v2332_v9  ;;  %v2410_v8 = vld [vmem:[#allocation2 + $0x1a8] ss:$16 sps:$4 sm:$0xff]   ;;  %v2413_v9 = vld [vmem:[#allocation2 + $0x560] ss:$16 sps:$4 sm:$0xff]  }
  0x4e   :  { %1392 = vmatprep.subr.bf16.mxu0 %v2337_v10  ;;  %1433 = vmatprep.subr.bf16.mxu1 %v2340_v12  ;;  %v2421_v10 = vld [vmem:[#allocation2 + $0x544] ss:$16 sps:$4 sm:$0xff]   ;;  %v2416_v12 = vld [vmem:[#allocation2 + $0x188] ss:$16 sps:$4 sm:$0xff]  }
  0x51   :  { %1393 = vmatpush2.bf16.msra.mxu0 %v2335_v11  ;;  %1434 = vmatpush2.bf16.msra.mxu1 %v2338_v13  ;;  %v2418_v11 = vld [vmem:[#allocation2 + $0x18c] ss:$16 sps:$4 sm:$0xff]   ;;  %v2419_v13 = vld [vmem:[#allocation2 + $0x540] ss:$16 sps:$4 sm:$0xff]  }
  0x52   :  { %1444 = vmatprep.subr.bf16.mxu0 %v2343_v16  ;;  %1499 = vmatprep.subr.bf16.mxu1 %v2346_v17  ;;  %v2422_v16 = vld [vmem:[#allocation2 + $0x168] ss:$16 sps:$4 sm:$0xff]   ;;  %v2425_v17 = vld [vmem:[#allocation2 + $0x520] ss:$16 sps:$4 sm:$0xff]  }
  0x54   :  { %1395 = vmatmul.mubr.bf16.vlgmr.msra.gmra.mxu0 %v2657_v18  ;;  %1436 = vmatmul.mubr.bf16.vlgmr.msra.gmra.mxu1 %v2659_v19 }
  0x55   :  { %1445 = vmatpush1.bf16.msra.mxu0 %v2341_v20  ;;  %1500 = vmatpush1.bf16.msra.mxu1 %v2344_v21  ;;  %v2433_v20 = vld [vmem:[#allocation2 + $0x504] ss:$16 sps:$4 sm:$0xff]   ;;  %v2430_v21 = vld [vmem:[#allocation2 + $0x14c] ss:$16 sps:$4 sm:$0xff]  }
  0x56   :  { %1446 = vmatprep.subr.bf16.mxu0 %v2349_v22  ;;  %1517 = vmatprep.mubr.bf16.mxu1 %v2566_v0  ;;  %v2428_v22 = vld [vmem:[#allocation2 + $0x148] ss:$16 sps:$4 sm:$0xff]  }
  0x57   :  { %1526 = vmatprep.subr.bf16.mxu1 %v2352_v23  ;;  %1476 = vmatprep.mubr.bf16.mxu0 %v2675_v44  ;;  %v2431_v23 = vld [vmem:[#allocation2 + $0x500] ss:$16 sps:$4 sm:$0xff]  }
  0x59   :  { %1447 = vmatpush1.bf16.msra.mxu0 %v2347_v24  ;;  %v50_v24 = vld [vmem:[%s2911_s0 + $0x20] sm:$0xff] }
  0x5a   :  { %1448 = vmatprep.subr.bf16.mxu0 %v2355_v25  ;;  %v2439_v25 = vld [vmem:[#allocation2 + $0x2ec] ss:$16 sps:$4 sm:$0xff]  }
  0x5c   :  { %2160 = vmatmul.mubr.msk.bf16.vlgmr.msra.gmra.mxu1 %vm1358_vm2, %v2667_v28 }
  0x5d   :  { %1449 = vmatpush1.bf16.msra.mxu0 %v2353_v27  ;;  %1527 = vmatpush1.bf16.msra.mxu1 %v2350_v29  ;;  %v2681_v27 = vpack.c.bf16 %v50_v24, %v50_v24  ;;  %v2434_v29 = vld [vmem:[#allocation2 + $0x128] ss:$16 sps:$4 sm:$0xff]  }
  0x5e   :  { %1450 = vmatprep.subr.bf16.mxu0 %v2361_v30  ;;  %1528 = vmatprep.subr.bf16.mxu1 %v2358_v31  ;;  %v2437_v30 = vld [vmem:[#allocation2 + $0x2e8] ss:$16 sps:$4 sm:$0xff]   ;;  %v2445_v31 = vld [vmem:[#allocation2 + $0x2cc] ss:$16 sps:$4 sm:$0xff]  }
  0x5f   :  { %1558 = vmatprep.mubr.bf16.mxu1 %v2645_v57  ;;  %v2394_v57 = vld [vmem:[#allocation2 + $0xc] ss:$16 sps:$4 sm:$0xff]   ;;  %v2518_v24 = vld [vmem:[#allocation2 + $0x568] ss:$16 sps:$4 sm:$0xff]  }
  0x61   :  { %1451 = vmatpush1.bf16.msra.mxu0 %v2359_v32  ;;  %1529 = vmatpush1.bf16.msra.mxu1 %v2356_v33  ;;  %v2442_v32 = vld [vmem:[#allocation2 + $0x10c] ss:$16 sps:$4 sm:$0xff]   ;;  %v2443_v33 = vld [vmem:[#allocation2 + $0x2c8] ss:$16 sps:$4 sm:$0xff]  }
  0x62   :  { %1452 = vmatprep.subr.bf16.mxu0 %v2367_v34  ;;  %1530 = vmatprep.subr.bf16.mxu1 %v2364_v35  ;;  %v2440_v34 = vld [vmem:[#allocation2 + $0x108] ss:$16 sps:$4 sm:$0xff]   ;;  %v2451_v35 = vld [vmem:[#allocation2 + $0x2ac] ss:$16 sps:$4 sm:$0xff]  }
  0x65   :  { %1453 = vmatpush1.bf16.msra.mxu0 %v2365_v36  ;;  %1531 = vmatpush1.bf16.msra.mxu1 %v2362_v37  ;;  %v2448_v36 = vld [vmem:[#allocation2 + $0x4ec] ss:$16 sps:$4 sm:$0xff]   ;;  %v2449_v37 = vld [vmem:[#allocation2 + $0x2a8] ss:$16 sps:$4 sm:$0xff]  }
  0x66   :  { %1454 = vmatprep.subr.bf16.mxu0 %v2373_v38  ;;  %1532 = vmatprep.subr.bf16.mxu1 %v2370_v39  ;;  %v2446_v38 = vld [vmem:[#allocation2 + $0x4e8] ss:$16 sps:$4 sm:$0xff]   ;;  %v2457_v39 = vld [vmem:[#allocation2 + $0x28c] ss:$16 sps:$4 sm:$0xff]  }
  0x69   :  { %1455 = vmatpush1.bf16.msra.mxu0 %v2371_v40  ;;  %1533 = vmatpush1.bf16.msra.mxu1 %v2368_v42  ;;  %v2454_v40 = vld [vmem:[#allocation2 + $0x4cc] ss:$16 sps:$4 sm:$0xff]  }
  0x6a   :  { %1456 = vmatprep.subr.bf16.mxu0 %v2379_v43  ;;  %1534 = vmatprep.subr.bf16.mxu1 %v2376_v45  ;;  %v2463_v42 = vld [vmem:[#allocation2 + $0x26c] ss:$16 sps:$4 sm:$0xff]   ;;  %v2461_v45 = vld [vmem:[#allocation2 + $0x268] ss:$16 sps:$4 sm:$0xff]  }
  0x6b   :  { %v2460_v43 = vld [vmem:[#allocation2 + $0x4ac] ss:$16 sps:$4 sm:$0xff]  }
  0x6d   :  { %1457 = vmatpush1.bf16.msra.mxu0 %v2377_v47  ;;  %1535 = vmatpush1.bf16.msra.mxu1 %v2374_v46  ;;  %v2458_v46 = vld [vmem:[#allocation2 + $0x4a8] ss:$16 sps:$4 sm:$0xff]   ;;  %v2469_v47 = vld [vmem:[#allocation2 + $0x24c] ss:$16 sps:$4 sm:$0xff]  }
  0x6e   :  { %1458 = vmatprep.subr.bf16.mxu0 %v2385_v48  ;;  %1536 = vmatprep.subr.bf16.mxu1 %v2382_v49  ;;  %v2466_v48 = vld [vmem:[#allocation2 + $0x48c] ss:$16 sps:$4 sm:$0xff]   ;;  %v2464_v49 = vld [vmem:[#allocation2 + $0x488] ss:$16 sps:$4 sm:$0xff]  }
  0x71   :  { %1459 = vmatpush1.bf16.msra.mxu0 %v2383_v51  ;;  %1537 = vmatpush1.bf16.msra.mxu1 %v2380_v50  ;;  %v2475_v50 = vld [vmem:[#allocation2 + $0x22c] ss:$16 sps:$4 sm:$0xff]  }
  0x72   :  { %1460 = vmatprep.subr.bf16.mxu0 %v2391_v52  ;;  %1538 = vmatprep.subr.bf16.mxu1 %v2388_v53  ;;  %v2472_v51 = vld [vmem:[#allocation2 + $0x46c] ss:$16 sps:$4 sm:$0xff]   ;;  %v2473_v52 = vld [vmem:[#allocation2 + $0x228] ss:$16 sps:$4 sm:$0xff]  }
  0x73   :  { %v2481_v53 = vld [vmem:[#allocation2 + $0x20c] ss:$16 sps:$4 sm:$0xff]  }
  0x75   :  { %1461 = vmatpush2.bf16.msra.mxu0 %v2389_v55  ;;  %1539 = vmatpush1.bf16.msra.mxu1 %v2386_v54  ;;  %v2478_v54 = vld [vmem:[#allocation2 + $0x44c] ss:$16 sps:$4 sm:$0xff]   ;;  %v2479_v55 = vld [vmem:[#allocation2 + $0x208] ss:$16 sps:$4 sm:$0xff]  }
  0x76   :  { %1462 = vmatprep.subr.bf16.mxu0 %v2397_v56  ;;  %1540 = vmatprep.subr.bf16.mxu1 %v2394_v57  ;;  %v2476_v56 = vld [vmem:[#allocation2 + $0x448] ss:$16 sps:$4 sm:$0xff]   ;;  %v2487_v57 = vld [vmem:[#allocation2 + $0x3ec] ss:$16 sps:$4 sm:$0xff]  }
  0x79   :  { %1463 = vmatpush2.bf16.msra.mxu0 %v2395_v60  ;;  %1541 = vmatpush1.bf16.msra.mxu1 %v2392_v59  ;;  %v2484_v59 = vld [vmem:[#allocation2 + $0x42c] ss:$16 sps:$4 sm:$0xff]   ;;  %v2485_v60 = vld [vmem:[#allocation2 + $0x3e8] ss:$16 sps:$4 sm:$0xff]  }
  0x7a   :  { %1464 = vmatprep.subr.bf16.mxu0 %v2403_v61  ;;  %1542 = vmatprep.subr.bf16.mxu1 %v2400_v62  ;;  %v2482_v61 = vld [vmem:[#allocation2 + $0x428] ss:$16 sps:$4 sm:$0xff]   ;;  %v2493_v62 = vld [vmem:[#allocation2 + $0x3cc] ss:$16 sps:$4 sm:$0xff]  }
  0x7d   :  { %1465 = vmatpush2.bf16.msra.mxu0 %v2401_v1  ;;  %1543 = vmatpush2.bf16.msra.mxu1 %v2398_v63  ;;  %v2490_v63 = vld [vmem:[#allocation2 + $0x40c] ss:$16 sps:$4 sm:$0xff]   ;;  %v2491_v1 = vld [vmem:[#allocation2 + $0x3c8] ss:$16 sps:$4 sm:$0xff]  }
  0x7e   :  { %1466 = vmatprep.subr.bf16.mxu0 %v2409_v2  ;;  %1544 = vmatprep.subr.bf16.mxu1 %v2406_v3  ;;  %v2488_v2 = vld [vmem:[#allocation2 + $0x408] ss:$16 sps:$4 sm:$0xff]   ;;  %v2499_v3 = vld [vmem:[#allocation2 + $0x3ac] ss:$16 sps:$4 sm:$0xff]  }
  0x81   :  { %1467 = vmatpush2.bf16.msra.mxu0 %v2407_v5  ;;  %1545 = vmatpush2.bf16.msra.mxu1 %v2404_v4  ;;  %v2496_v4 = vld [vmem:[#allocation2 + $0x5ec] ss:$16 sps:$4 sm:$0xff]   ;;  %v2497_v5 = vld [vmem:[#allocation2 + $0x3a8] ss:$16 sps:$4 sm:$0xff]  }
  0x82   :  { %1468 = vmatprep.subr.bf16.mxu0 %v2415_v6  ;;  %1546 = vmatprep.subr.bf16.mxu1 %v2412_v7  ;;  %v2494_v6 = vld [vmem:[#allocation2 + $0x5e8] ss:$16 sps:$4 sm:$0xff]   ;;  %v2505_v7 = vld [vmem:[#allocation2 + $0x38c] ss:$16 sps:$4 sm:$0xff]  }
  0x85   :  { %1469 = vmatpush2.bf16.msra.mxu0 %v2413_v9  ;;  %1547 = vmatpush2.bf16.msra.mxu1 %v2410_v8  ;;  %v2502_v8 = vld [vmem:[#allocation2 + $0x5cc] ss:$16 sps:$4 sm:$0xff]   ;;  %v2503_v9 = vld [vmem:[#allocation2 + $0x388] ss:$16 sps:$4 sm:$0xff]  }
  0x86   :  { %1470 = vmatprep.subr.bf16.mxu0 %v2421_v10  ;;  %1548 = vmatprep.subr.bf16.mxu1 %v2418_v11  ;;  %v2500_v10 = vld [vmem:[#allocation2 + $0x5c8] ss:$16 sps:$4 sm:$0xff]   ;;  %v2511_v11 = vld [vmem:[#allocation2 + $0x36c] ss:$16 sps:$4 sm:$0xff]  }
  0x89   :  { %1471 = vmatpush2.bf16.msra.mxu0 %v2419_v13  ;;  %1549 = vmatpush2.bf16.msra.mxu1 %v2416_v12  ;;  %v2508_v12 = vld [vmem:[#allocation2 + $0x5ac] ss:$16 sps:$4 sm:$0xff]   ;;  %v2509_v13 = vld [vmem:[#allocation2 + $0x368] ss:$16 sps:$4 sm:$0xff]  }
  0x8a   :  { %1472 = vmatprep.subr.bf16.mxu0 %v2427_v14  ;;  %1550 = vmatprep.subr.bf16.mxu1 %v2424_v15  ;;  %v2506_v14 = vld [vmem:[#allocation2 + $0x5a8] ss:$16 sps:$4 sm:$0xff]   ;;  %v2517_v15 = vld [vmem:[#allocation2 + $0x34c] ss:$16 sps:$4 sm:$0xff]  }
  0x8d   :  { %1473 = vmatpush2.bf16.msra.mxu0 %v2425_v17  ;;  %1551 = vmatpush2.bf16.msra.mxu1 %v2422_v16  ;;  %v2514_v16 = vld [vmem:[#allocation2 + $0x58c] ss:$16 sps:$4 sm:$0xff]   ;;  %v2515_v17 = vld [vmem:[#allocation2 + $0x348] ss:$16 sps:$4 sm:$0xff]  }
  0x8e   :  { %1474 = vmatprep.subr.bf16.mxu0 %v2433_v20  ;;  %1552 = vmatprep.subr.bf16.mxu1 %v2430_v21  ;;  %v2512_v20 = vld [vmem:[#allocation2 + $0x588] ss:$16 sps:$4 sm:$0xff]   ;;  %v2523_v21 = vld [vmem:[#allocation2 + $0x32c] ss:$16 sps:$4 sm:$0xff]  }
  0x91   :  { %1475 = vmatpush2.bf16.msra.mxu0 %v2431_v23  ;;  %1553 = vmatpush2.bf16.msra.mxu1 %v2428_v22  ;;  %v2520_v22 = vld [vmem:[#allocation2 + $0x56c] ss:$16 sps:$4 sm:$0xff]   ;;  %v2521_v23 = vld [vmem:[#allocation2 + $0x328] ss:$16 sps:$4 sm:$0xff]  }
  0x92   :  { %1567 = vmatprep.subr.bf16.mxu0 %v2439_v25  ;;  %1554 = vmatprep.subr.bf16.mxu1 %v2436_v26  ;;  %v2529_v25 = vld [vmem:[#allocation2 + $0x30c] ss:$16 sps:$4 sm:$0xff]  }
  0x93   :  { %v2526_v26 = vld [vmem:[#allocation2 + $0x54c] ss:$16 sps:$4 sm:$0xff]  }
  0x94   :  { %1477 = vmatmul.mubr.bf16.vlgmr.msra.gmra.mxu0 %v2681_v27 }
  0x95   :  { %1568 = vmatpush1.bf16.msra.mxu0 %v2437_v30  ;;  %1599 = vmatprep.mubr.bf16.mxu0 %v2647_v58  ;;  %v2452_v58 = vld [vmem:[#allocation2 + $0x4c8] ss:$16 sps:$4 sm:$0xff]  }
  0x96   :  { %1555 = vmatpush2.bf16.msra.mxu1 %v2434_v29  ;;  %1569 = vmatprep.subr.bf16.mxu0 %v2445_v31  ;;  %v2527_v29 = vld [vmem:[#allocation2 + $0x308] ss:$16 sps:$4 sm:$0xff]   ;;  %v2535_v31 = vld [vmem:[#allocation2 + $0x60c] ss:$16 sps:$4 sm:$0xff]  }
  0x97   :  { %1556 = vmatprep.subr.bf16.mxu1 %v2442_v32  ;;  %v2524_v30 = vld [vmem:[#allocation2 + $0x548] ss:$16 sps:$4 sm:$0xff]   ;;  %v2532_v32 = vld [vmem:[#allocation2 + $0x52c] ss:$16 sps:$4 sm:$0xff]  }
  0x99   :  { %1570 = vmatpush1.bf16.msra.mxu0 %v2443_v33  ;;  %v2533_v33 = vld [vmem:[#allocation2 + $0x608] ss:$16 sps:$4 sm:$0xff]  }
  0x9a   :  { %1557 = vmatpush2.bf16.msra.mxu1 %v2440_v34  ;;  %1571 = vmatprep.subr.bf16.mxu0 %v2451_v35  ;;  %v2530_v34 = vld [vmem:[#allocation2 + $0x528] ss:$16 sps:$4 sm:$0xff]   ;;  %v2538_v35 = vld [vmem:[#allocation2 + $0x50c] ss:$16 sps:$4 sm:$0xff]  }
  0x9b   :  { %1608 = vmatprep.subr.bf16.mxu1 %v2448_v36  ;;  %v1751_v36 = vld [vmem:[%s2917_s6 + $0xf8] sm:$0xff] }
  0x9d   :  { %1559 = vmatmul.mubr.bf16.vlgmr.msra.gmra.mxu1 %v2657_v18  ;;  %1572 = vmatpush1.bf16.msra.mxu0 %v2449_v37  ;;  %v2467_v18 = vld [vmem:[#allocation2 + $0x248] ss:$16 sps:$4 sm:$0xff]  }
  0x9e   :  { %1609 = vmatpush1.bf16.msra.mxu1 %v2446_v38  ;;  %1573 = vmatprep.subr.bf16.mxu0 %v2457_v39 }
  0x9f   :  { %1610 = vmatprep.subr.bf16.mxu1 %v2454_v40  ;;  %1640 = vmatprep.mubr.bf16.mxu1 %v2675_v44  ;;  %v2470_v44 = vld [vmem:[#allocation2 + $0x468] ss:$16 sps:$4 sm:$0xff]  }
  0xa1   :  { %1574 = vmatpush1.bf16.msra.mxu0 %v2455_v41  ;;  %v2536_v41 = vld [vmem:[#allocation2 + $0x508] ss:$16 sps:$4 sm:$0xff]  }
  0xa2   :  { %1611 = vmatpush1.bf16.msra.mxu1 %v2452_v58  ;;  %1575 = vmatprep.subr.bf16.mxu0 %v2463_v42 }
  0xa3   :  { %1612 = vmatprep.subr.bf16.mxu1 %v2460_v43 }
  0xa5   :  { %1576 = vmatpush1.bf16.msra.mxu0 %v2461_v45 }
  0xa6   :  { %1613 = vmatpush1.bf16.msra.mxu1 %v2458_v46  ;;  %1577 = vmatprep.subr.bf16.mxu0 %v2469_v47  ;;  %v1734_v46 = vld [vmem:[%s2917_s6 + $0x70] sm:$0xff]  ;;  %v1749_v47 = vld [vmem:[%s2917_s6 + $0xe8] sm:$0xff] }
  0xa7   :  { %1614 = vmatprep.subr.bf16.mxu1 %v2466_v48  ;;  %v1733_v48 = vld [vmem:[%s2917_s6 + $0x68] sm:$0xff] }
  0xa9   :  { %1578 = vmatpush1.bf16.msra.mxu0 %v2467_v18  ;;  %v1747_v18 = vld [vmem:[%s2917_s6 + $0xd8] sm:$0xff] }
  0xaa   :  { %1615 = vmatpush1.bf16.msra.mxu1 %v2464_v49  ;;  %1579 = vmatprep.subr.bf16.mxu0 %v2475_v50  ;;  %v1731_v49 = vld [vmem:[%s2917_s6 + $0x58] sm:$0xff]  ;;  %v1746_v50 = vld [vmem:[%s2917_s6 + $0xd0] sm:$0xff] }
  0xab   :  { %1616 = vmatprep.subr.bf16.mxu1 %v2472_v51  ;;  %v1783_v51 = vld [vmem:[%s2917_s6 + $0x1f8] sm:$0xff] }
  0xad   :  { %1580 = vmatpush1.bf16.msra.mxu0 %v2473_v52  ;;  %v1767_v52 = vld [vmem:[%s2917_s6 + $0x178] sm:$0xff] }
  0xae   :  { %1617 = vmatpush1.bf16.msra.mxu1 %v2470_v44  ;;  %1581 = vmatprep.subr.bf16.mxu0 %v2481_v53  ;;  %v1782_v44 = vld [vmem:[%s2917_s6 + $0x1f0] sm:$0xff] }
  0xaf   :  { %1618 = vmatprep.subr.bf16.mxu1 %v2478_v54  ;;  %v1730_v53 = vld [vmem:[%s2917_s6 + $0x50] sm:$0xff] }
  0xb0   :  { %v1766_v54 = vld [vmem:[%s2917_s6 + $0x170] sm:$0xff] }
  0xb1   :  { %1582 = vmatpush1.bf16.msra.mxu0 %v2479_v55  ;;  %v1745_v55 = vld [vmem:[%s2917_s6 + $0xc8] sm:$0xff] }
  0xb2   :  { %1619 = vmatpush1.bf16.msra.mxu1 %v2476_v56  ;;  %1583 = vmatprep.subr.bf16.mxu0 %v2487_v57  ;;  %v1781_v56 = vld [vmem:[%s2917_s6 + $0x1e8] sm:$0xff] }
  0xb3   :  { %1620 = vmatprep.subr.bf16.mxu1 %v2484_v59  ;;  %v1729_v57 = vld [vmem:[%s2917_s6 + $0x48] sm:$0xff] }
  0xb4   :  { %v1765_v59 = vld [vmem:[%s2917_s6 + $0x168] sm:$0xff] }
  0xb5   :  { %1584 = vmatpush2.bf16.msra.mxu0 %v2485_v60  ;;  %v1744_v60 = vld [vmem:[%s2917_s6 + $0xc0] sm:$0xff] }
  0xb6   :  { %1621 = vmatpush1.bf16.msra.mxu1 %v2482_v61  ;;  %1585 = vmatprep.subr.bf16.mxu0 %v2493_v62  ;;  %v1780_v61 = vld [vmem:[%s2917_s6 + $0x1e0] sm:$0xff] }
  0xb7   :  { %1622 = vmatprep.subr.bf16.mxu1 %v2490_v63  ;;  %v1728_v62 = vld [vmem:[%s2917_s6 + $0x40] sm:$0xff] }
  0xb8   :  { %v1764_v63 = vld [vmem:[%s2917_s6 + $0x160] sm:$0xff] }
  0xb9   :  { %1586 = vmatpush2.bf16.msra.mxu0 %v2491_v1  ;;  %v1743_v1 = vld [vmem:[%s2917_s6 + $0xb8] sm:$0xff] }
  0xba   :  { %1623 = vmatpush1.bf16.msra.mxu1 %v2488_v2  ;;  %1587 = vmatprep.subr.bf16.mxu0 %v2499_v3  ;;  %v1779_v2 = vld [vmem:[%s2917_s6 + $0x1d8] sm:$0xff] }
  0xbb   :  { %1624 = vmatprep.subr.bf16.mxu1 %v2496_v4  ;;  %v1727_v3 = vld [vmem:[%s2917_s6 + $0x38] sm:$0xff] }
  0xbc   :  { %v1763_v4 = vld [vmem:[%s2917_s6 + $0x158] sm:$0xff] }
  0xbd   :  { %1588 = vmatpush2.bf16.msra.mxu0 %v2497_v5  ;;  %v1742_v5 = vld [vmem:[%s2917_s6 + $0xb0] sm:$0xff] }
  0xbe   :  { %1625 = vmatpush2.bf16.msra.mxu1 %v2494_v6  ;;  %1589 = vmatprep.subr.bf16.mxu0 %v2505_v7  ;;  %v1778_v6 = vld [vmem:[%s2917_s6 + $0x1d0] sm:$0xff] }
  0xbf   :  { %1626 = vmatprep.subr.bf16.mxu1 %v2502_v8  ;;  %v1726_v7 = vld [vmem:[%s2917_s6 + $0x30] sm:$0xff] }
  0xc0   :  { %v1762_v8 = vld [vmem:[%s2917_s6 + $0x150] sm:$0xff] }
  0xc1   :  { %1590 = vmatpush2.bf16.msra.mxu0 %v2503_v9  ;;  %v1741_v9 = vld [vmem:[%s2917_s6 + $0xa8] sm:$0xff] }
  0xc2   :  { %1627 = vmatpush2.bf16.msra.mxu1 %v2500_v10  ;;  %1591 = vmatprep.subr.bf16.mxu0 %v2511_v11  ;;  %v1777_v10 = vld [vmem:[%s2917_s6 + $0x1c8] sm:$0xff] }
  0xc3   :  { %1628 = vmatprep.subr.bf16.mxu1 %v2508_v12  ;;  %v1725_v11 = vld [vmem:[%s2917_s6 + $0x28] sm:$0xff]  ;;  %v1740_v12 = vld [vmem:[%s2917_s6 + $0xa0] sm:$0xff] }
  0xc5   :  { %1592 = vmatpush2.bf16.msra.mxu0 %v2509_v13  ;;  %v1724_v13 = vld [vmem:[%s2917_s6 + $0x20] sm:$0xff] }
  0xc6   :  { %1629 = vmatpush2.bf16.msra.mxu1 %v2506_v14  ;;  %1593 = vmatprep.subr.bf16.mxu0 %v2517_v15  ;;  %v1739_v14 = vld [vmem:[%s2917_s6 + $0x98] sm:$0xff] }
  0xc7   :  { %1630 = vmatprep.subr.bf16.mxu1 %v2514_v16  ;;  %v1723_v15 = vld [vmem:[%s2917_s6 + $0x18] sm:$0xff]  ;;  %v1738_v16 = vld [vmem:[%s2917_s6 + $0x90] sm:$0xff] }
  0xc9   :  { %1594 = vmatpush2.bf16.msra.mxu0 %v2515_v17  ;;  %v1722_v17 = vld [vmem:[%s2917_s6 + $0x10] sm:$0xff] }
  0xca   :  { %1631 = vmatpush2.bf16.msra.mxu1 %v2512_v20  ;;  %1595 = vmatprep.subr.bf16.mxu0 %v2523_v21  ;;  %v1737_v20 = vld [vmem:[%s2917_s6 + $0x88] sm:$0xff] }
  0xcb   :  { %1632 = vmatprep.subr.bf16.mxu1 %v2520_v22  ;;  %v1721_v21 = vld [vmem:[%s2917_s6 + $0x8] sm:$0xff]  ;;  %v1736_v22 = vld [vmem:[%s2917_s6 + $0x80] sm:$0xff] }
  0xcd   :  { %1596 = vmatpush2.bf16.msra.mxu0 %v2521_v23  ;;  %v1720_v23 = vld [vmem:[%s2917_s6] sm:$0xff] }
  0xce   :  { %1633 = vmatpush2.bf16.msra.mxu1 %v2518_v24  ;;  %1597 = vmatprep.subr.bf16.mxu0 %v2529_v25 }
  0xcf   :  { %1634 = vmatprep.subr.bf16.mxu1 %v2526_v26 }
  0xd1   :  { %1598 = vmatpush2.bf16.msra.mxu0 %v2527_v29  ;;  %v1761_v29 = vld [vmem:[%s2917_s6 + $0x148] sm:$0xff] }
  0xd2   :  { %1635 = vmatpush2.bf16.msra.mxu1 %v2524_v30  ;;  %1663 = vmatprep.subr.bf16.mxu0 %v2535_v31  ;;  %v1776_v30 = vld [vmem:[%s2917_s6 + $0x1c0] sm:$0xff] }
  0xd3   :  { %1636 = vmatprep.subr.bf16.mxu1 %v2532_v32 }
  0xd4   :  { %v2690_v37 = vpop.f32.mrf.mxu0  ;;  %v2692_v38 = vpop.f32.mrf.mxu1  ;;  %1600 = vmatmul.mubr.bf16.vlgmr.msra.gmra.mxu0 %v2659_v19  ;;  %v1735_v19 = vld [vmem:[%s2917_s6 + $0x78] sm:$0xff] }
  0xd5   :  { %1664 = vmatpush1.bf16.msra.mxu0 %v2533_v33  ;;  %1681 = vmatprep.mubr.bf16.mxu0 %v2566_v0  ;;  %v1750_v0 = vld [vmem:[%s2917_s6 + $0xf0] sm:$0xff] }
  0xd6   :  { %1637 = vmatpush2.bf16.msra.mxu1 %v2530_v34  ;;  %v2696_v39 = vpop.f32.mrf.mxu0  ;;  %v2698_v40 = vpop.f32.mrf.mxu1  ;;  %2163 = vmatprep.subr.mxu0 %v1751_v36  ;;  %v1760_v34 = vld [vmem:[%s2917_s6 + $0x140] sm:$0xff] }
  0xd7   :  { %1638 = vmatprep.subr.bf16.mxu1 %v2538_v35  ;;  %v1775_v35 = vld [vmem:[%s2917_s6 + $0x1b8] sm:$0xff] }
  0xd8   :  { %v334_v58 = vpop.f32.mrf.mxu0  ;;  %v375_v42 = vpop.f32.mrf.mxu1 }
  0xda   :  { %1639 = vmatpush2.bf16.msra.mxu1 %v2536_v41  ;;  %v335_v43 = vpop.f32.mrf.mxu0  ;;  %v376_v45 = vpop.f32.mrf.mxu1  ;;  %v1774_v41 = vld [vmem:[%s2917_s6 + $0x1b0] sm:$0xff] }
  0xdb   :  { %2198 = vmatprep.subr.mxu1 %v1783_v51  ;;  %v1758_v43 = vld [vmem:[%s2917_s6 + $0x130] sm:$0xff] }
  0xdc   :  { %2161 = vmatmul.mubr.msk.bf16.vlgmr.msra.gmra.mxu0 %vm1358_vm2, %v2667_v28  ;;  %v1748_v28 = vld [vmem:[%s2917_s6 + $0xe0] sm:$0xff] }
  0xdd   :  { %1641 = vmatmul.mubr.bf16.vlgmr.msra.gmra.mxu1 %v2681_v27  ;;  %2164 = vmatpush3.msra.mxu0 %v1735_v19  ;;  %v1732_v27 = vld [vmem:[%s2917_s6 + $0x60] sm:$0xff]  ;;  %v1773_v19 = vld [vmem:[%s2917_s6 + $0x1a8] sm:$0xff] }
  0xde   :  { %2165 = vmatprep.subr.mxu0 %v1750_v0  ;;  %2199 = vmatpush3.msra.mxu1 %v1767_v52  ;;  %v1754_v52 = vld [vmem:[%s2917_s6 + $0x110] sm:$0xff] }
  0xdf   :  { %2166 = vmatpush3.msra.mxu0 %v1734_v46  ;;  %2200 = vmatprep.subr.mxu1 %v1782_v44  ;;  %v1757_v46 = vld [vmem:[%s2917_s6 + $0x128] sm:$0xff] }
  0xe0   :  { %2167 = vmatprep.subr.mxu0 %v1749_v47  ;;  %2201 = vmatpush3.msra.mxu1 %v1766_v54  ;;  %v1772_v47 = vld [vmem:[%s2917_s6 + $0x1a0] sm:$0xff]  ;;  %v1769_v44 = vld [vmem:[%s2917_s6 + $0x188] sm:$0xff] }
  0xe1   :  { %2168 = vmatpush3.msra.mxu0 %v1733_v48  ;;  %2202 = vmatprep.subr.mxu1 %v1781_v56  ;;  %v1768_v54 = vld [vmem:[%s2917_s6 + $0x180] sm:$0xff] }
  0xe2   :  { %2169 = vmatprep.subr.mxu0 %v1748_v28  ;;  %2203 = vmatpush3.msra.mxu1 %v1765_v59  ;;  %v1756_v28 = vld [vmem:[%s2917_s6 + $0x120] sm:$0xff] }
  0xe3   :  { %2170 = vmatpush3.msra.mxu0 %v1732_v27  ;;  %2204 = vmatprep.subr.mxu1 %v1780_v61  ;;  %v1771_v27 = vld [vmem:[%s2917_s6 + $0x198] sm:$0xff]  ;;  %v54_v56 = vld [vmem:[%s2913_s2] sm:$0xff] }
  0xe4   :  { %2171 = vmatprep.subr.mxu0 %v1747_v18  ;;  %2205 = vmatpush3.msra.mxu1 %v1764_v63 }
  0xe5   :  { %2172 = vmatpush3.msra.mxu0 %v1731_v49  ;;  %2206 = vmatprep.subr.mxu1 %v1779_v2  ;;  %v1755_v49 = vld [vmem:[%s2917_s6 + $0x118] sm:$0xff] }
  0xe6   :  { %2173 = vmatprep.subr.mxu0 %v1746_v50  ;;  %2207 = vmatpush3.msra.mxu1 %v1763_v4  ;;  %v1770_v50 = vld [vmem:[%s2917_s6 + $0x190] sm:$0xff] }
  0xe7   :  { %2174 = vmatpush3.msra.mxu0 %v1730_v53  ;;  %2208 = vmatprep.subr.mxu1 %v1778_v6  ;;  %v1753_v53 = vld [vmem:[%s2917_s6 + $0x108] sm:$0xff] }
  0xe8   :  { %2175 = vmatprep.subr.mxu0 %v1745_v55  ;;  %2209 = vmatpush3.msra.mxu1 %v1762_v8  ;;  %v1752_v55 = vld [vmem:[%s2917_s6 + $0x100] sm:$0xff] }
  0xe9   :  { %2176 = vmatpush3.msra.mxu0 %v1729_v57  ;;  %2210 = vmatprep.subr.mxu1 %v1777_v10  ;;  %v1692_v57 = vlaneseq }
  0xea   :  { %2177 = vmatprep.subr.mxu0 %v1744_v60  ;;  %2211 = vmatpush3.msra.mxu1 %v1761_v29 }
  0xeb   :  { %2178 = vmatpush3.msra.mxu0 %v1728_v62  ;;  %2212 = vmatprep.subr.mxu1 %v1776_v30  ;;  %v1693_v59 = vshrl.u32 %v1692_v57, 7  ;;  %v1690_v62 = vld [vmem:[%s2916_s5] sm:$0xf] }
  0xec   :  { %2179 = vmatprep.subr.mxu0 %v1743_v1  ;;  %2213 = vmatpush3.msra.mxu1 %v1760_v34 }
  0xed   :  { %2180 = vmatpush3.msra.mxu0 %v1727_v3  ;;  %2214 = vmatprep.subr.mxu1 %v1775_v35  ;;  %v1694_v61 = vsub.s32 0, %v1693_v59  ;;  %v1698_v63 = vsub.s32 1, %v1693_v59 }
  0xee   :  { %2181 = vmatprep.subr.mxu0 %v1742_v5  ;;  %1934 = vrot.lane.b32.xlu0 %v54_v56, %s2567_s20 }
  0xef   :  { %2182 = vmatpush3.msra.mxu0 %v1726_v7  ;;  %v1695_v4 = vrot.slane %v1690_v62, %v1694_v61  ;;  %v1699_v8 = vrot.slane %v1690_v62, %v1698_v63 }
  0xf0   :  { %2183 = vmatprep.subr.mxu0 %v1741_v9 }
  0xf1   :  { %2184 = vmatpush3.msra.mxu0 %v1725_v11 }
  0xf2   :  { %2185 = vmatprep.subr.mxu0 %v1740_v12 }
  0xf3   :  { %2186 = vmatpush3.msra.mxu0 %v1724_v13 }
  0xf4   :  { %2187 = vmatprep.subr.mxu0 %v1739_v14 }
  0xf5   :  { %2188 = vmatpush3.msra.mxu0 %v1723_v15 }
  0xf6   :  { %2189 = vmatprep.subr.mxu0 %v1738_v16 }
  0xf7   :  { %2190 = vmatpush3.msra.mxu0 %v1722_v17 }
  0xf8   :  { %2191 = vmatprep.subr.mxu0 %v1737_v20 }
  0xf9   :  { %2192 = vmatpush3.msra.mxu0 %v1721_v21 }
  0xfa   :  { %2193 = vmatprep.subr.mxu0 %v1736_v22 }
  0xfb   :  { %2194 = vmatpush3.msra.mxu0 %v1720_v23 }
 0x114   :  { %v1396_v24 = vpop.f32.mrf.mxu0  ;;  %v1437_v26 = vpop.f32.mrf.mxu1 }
 0x115   :  { %v1397_v25 = vadd.f32 %v1396_v24, %v2690_v37  ;;  %v1759_v37 = vld [vmem:[%s2917_s6 + $0x138] sm:$0xff] }
 0x116   :  { %v1398_v31 = vpop.f32.mrf.mxu0  ;;  %v1439_v33 = vpop.f32.mrf.mxu1  ;;  %2215 = vmatpush3.msra.mxu1 %v1759_v37 }
 0x117   :  { %v1438_v32 = vadd.f32 %v1437_v26, %v1397_v25  ;;  %2216 = vmatprep.subr.mxu1 %v1774_v41  ;;  %v1399_v60 = vadd.f32 %v1398_v31, %v2696_v39  ;;  %v1702_v26 = vsub.s32 2, %v1693_v59 }
 0x118   :  { %v1400_v36 = vpop.f32.mrf.mxu0  ;;  %v1441_v58 = vpop.f32.mrf.mxu1  ;;  %2217 = vmatpush3.msra.mxu1 %v1758_v43 }
 0x119   :  { %2218 = vmatprep.subr.mxu1 %v1773_v19  ;;  %v1440_v2 = vadd.f32 %v1439_v33, %v1399_v60  ;;  %v1703_v37 = vrot.slane %v1690_v62, %v1702_v26 }
 0x11a   :  { %v1401_v42 = vpop.f32.mrf.mxu0  ;;  %v1442_v45 = vpop.f32.mrf.mxu1  ;;  %2219 = vmatpush3.msra.mxu1 %v1757_v46 }
 0x11b   :  { %2220 = vmatprep.subr.mxu1 %v1772_v47 }
 0x11c   :  { %v1519_v0 = vpop.f32.mrf.mxu1  ;;  %2221 = vmatpush3.msra.mxu1 %v1756_v28 }
 0x11d   :  { %2222 = vmatprep.subr.mxu1 %v1771_v27 }
 0x11e   :  { %v1521_v48 = vpop.f32.mrf.mxu1  ;;  %2223 = vmatpush3.msra.mxu1 %v1755_v49 }
 0x11f   :  { %2224 = vmatprep.subr.mxu1 %v1770_v50  ;;  %v2162_v50 = vld [vmem:[%s2918_s7] ss:$0 sm:$0xff] }
 0x120   :  { %v1523_v18 = vpop.f32.mrf.mxu1  ;;  %2225 = vmatpush3.msra.mxu1 %v1754_v52 }
 0x121   :  { %2226 = vmatprep.subr.mxu1 %v1769_v44 }
 0x122   :  { %v1524_v51 = vpop.f32.mrf.mxu1  ;;  %2227 = vmatpush3.msra.mxu1 %v1753_v53 }
 0x123   :  { %2228 = vmatprep.subr.mxu1 %v1768_v54 }
 0x124   :  { %2229 = vmatpush3.msra.mxu1 %v1752_v55 }
 0x154   :  { %v1478_v1 = vpop.f32.mrf.mxu0 }
 0x155   :  { %v1479_v3 = vadd.f32 %v1478_v1, %v1438_v32  ;;  %v1706_v32 = vsub.s32 3, %v1693_v59 }
 0x156   :  { %v1480_v5 = vpop.f32.mrf.mxu0 }
 0x157   :  { %v1520_v6 = vadd.f32 %v1519_v0, %v1479_v3  ;;  %v1481_v7 = vadd.f32 %v1480_v5, %v1440_v2  ;;  %v1707_v43 = vrot.slane %v1690_v62, %v1706_v32 }
 0x158   :  { %v1482_v9 = vpop.f32.mrf.mxu0 }
 0x159   :  { %v1522_v10 = vadd.f32 %v1521_v48, %v1481_v7  ;;  %v1712_v11 = vadd.f32 %v1695_v4, %v1520_v6 }
 0x15a   :  { %v1483_v12 = vpop.f32.mrf.mxu0 }
 0x15b   :  { %v1713_v13 = vadd.f32 %v1699_v8, %v1522_v10  ;;  %v1716_v15 = vmax.f32 %v1712_v11, 0.0 }
 0x15d   :  { %v1560_v39 = vpop.f32.mrf.mxu1  ;;  %v1717_v14 = vmax.f32 %v1713_v13, 0.0 }
 0x15e   :  { %v1561_v24 = vadd.f32 %v1560_v39, %v2692_v38 }
 0x15f   :  { %v1562_v16 = vpop.f32.mrf.mxu1  ;;  %1855 = vmatprep.mubr.f32.mxu0 %v1717_v14 }
 0x160   :  { %1856 = vmatmul.mubr.f32.vlgmr.msra.gmra.mxu0 %v1716_v15  ;;  %v1563_v29 = vadd.f32 %v1562_v16, %v2698_v40  ;;  %v1935_v56 = vpop.permute.xlu0 %1934 }
 0x161   :  { %v1564_v17 = vpop.f32.mrf.mxu1 }
 0x163   :  { %v1565_v20 = vpop.f32.mrf.mxu1 }
 0x194   :  { %v1601_v21 = vpop.f32.mrf.mxu0 }
 0x195   :  { %v1602_v30 = vadd.f32 %v1601_v21, %v1561_v24 }
 0x196   :  { %v1603_v22 = vpop.f32.mrf.mxu0 }
 0x197   :  { %v1604_v34 = vadd.f32 %v1603_v22, %v1563_v29 }
 0x198   :  { %v1605_v23 = vpop.f32.mrf.mxu0 }
 0x19a   :  { %v1606_v25 = vpop.f32.mrf.mxu0 }
 0x19c   :  { %v1683_v31 = vpop.f32.mrf.mxu0 }
 0x19d   :  { %v1642_v33 = vpop.f32.mrf.mxu1 }
 0x19e   :  { %v1643_v35 = vadd.f32 %v1642_v33, %v1602_v30  ;;  %v1685_v36 = vpop.f32.mrf.mxu0 }
 0x19f   :  { %v1644_v41 = vpop.f32.mrf.mxu1 }
 0x1a0   :  { %v1684_v58 = vadd.f32 %v1683_v31, %v1643_v35  ;;  %v1645_v42 = vadd.f32 %v1644_v41, %v1604_v34  ;;  %v1687_v45 = vpop.f32.mrf.mxu0 }
 0x1a1   :  { %v1646_v19 = vpop.f32.mrf.mxu1 }
 0x1a2   :  { %v1686_v0 = vadd.f32 %v1685_v36, %v1645_v42  ;;  %v1688_v38 = vpop.f32.mrf.mxu0  ;;  %v1714_v46 = vadd.f32 %v1703_v37, %v1684_v58 }
 0x1a3   :  { %v1647_v47 = vpop.f32.mrf.mxu1 }
 0x1a4   :  { %v1715_v48 = vadd.f32 %v1707_v43, %v1686_v0  ;;  %v1718_v28 = vmax.f32 %v1714_v46, 0.0 }
 0x1a6   :  { %v1719_v40 = vmax.f32 %v1715_v48, 0.0 }
 0x1a8   :  { %1925 = vmatprep.mubr.f32.mxu1 %v1719_v40 }
 0x1a9   :  { %1926 = vmatmul.mubr.f32.vlgmr.msra.gmra.mxu1 %v1718_v28 }
 0x220   :  { %v2195_v27 = vpop.f32.mrf.mxu0 }
 0x222   :  { %v2196_v18 = vpop.f32.mrf.mxu0 }
 0x223   :  { %v2197_v49 = vadd.f32 %v2196_v18, %v2195_v27 }
 0x225   :  { %v1858_v44 = vadd.f32 %v2197_v49, %v2162_v50 }
 0x269   :  { %v2230_v51 = vpop.f32.mrf.mxu1 }
 0x26b   :  { %v2231_v52 = vpop.f32.mrf.mxu1 }
 0x26c   :  { %v2232_v53 = vadd.f32 %v2231_v52, %v2230_v51 }
 0x26e   :  { %v1928_v54 = vadd.f32 %v2232_v53, %v1858_v44 }
 0x270   :  { %v1931_v55 = vmul.f32 1.442695, %v1928_v54  ;;  %1946 = vst.msk [vmem:[%s2920_s9] sm:$0xff] %vm1945_vm3, %v1928_v54 }
 0x272   :  { %2539 = vpow2.f32 %v1931_v55 }
 0x27f   :  { %v2540_v57 = vpop.eup %2539 }
 0x280   :  { %v1937_v59 = vmul.f32 %v2540_v57, %v1935_v56 }
 0x282   :  { %1939 = vrot.lane.b32.xlu0 %v1937_v59, %s2568_s23 }
 0x2f4   :  { %v1940_v60 = vpop.permute.xlu0 %1939 }
 0x2f5   :  { %v1942_v61 = vadd.f32 %v1940_v60, %v1928_v54 }
 0x2f7   :  { %1944 = vst.msk [vmem:[%s2919_s8] sm:$0xff] %vm1943_vm4, %v1942_v61 }
 0x2f8   :  { %1955 = vsyncpa [#allocation3], 1 }

</bundles_post_ra>
